<compile_context>
chip_gen: v7x
topology: tpu7x:2x2x1
jax: 0.10.0
libtpu: 0.0.40
codegen_flags: <defaults>
</compile_context>

<pallas_src>
import functools

import jax
import jax.numpy as jnp
from jax import lax
from jax.experimental import pallas as pl
from jax.experimental.pallas import tpu as pltpu

_NEG_BIG = -1.0e30  # finite "minus infinity" (avoids inf-inf NaNs in the online update)


def _lm_target_kernel(x_ref, w_ref, b_ref, tgt_ref, seg_ref, out_ref,
                      m_scr, l_scr, tl_scr,
                      *, n_tokens, vocab_size, mask_oob_cols):
    i = pl.program_id(0)          # token-tile index (parallel)
    j = pl.program_id(1)          # vocab-tile index (arbitrary / reduction)
    nv = pl.num_programs(1)

    tm = x_ref.shape[0]
    tv = w_ref.shape[0]

    # ---- init online-softmax state at the first vocab step -----------------
    @pl.when(j == 0)
    def _():
        m_scr[...] = jnp.full_like(m_scr, _NEG_BIG)   # running max
        l_scr[...] = jnp.zeros_like(l_scr)            # running sum(exp)
        tl_scr[...] = jnp.zeros_like(tl_scr)          # target logit

    # ---- logits for this (token-tile, vocab-tile) ---------------------------
    # weight is [V, H] (torch layout); contract on H.  Same trans-B pattern as
    # flash-attention q@k.T -> MXU-native, no per-tile XLU transpose expected.
    x = x_ref[...]                                    # (tm, H), input dtype
    w = w_ref[...]                                    # (tv, H), input dtype
    logits = lax.dot_general(x, w, (((1,), (1,)), ((), ())),
                             preferred_element_type=jnp.float32)   # (tm, tv) f32
    logits = logits + b_ref[...].astype(jnp.float32)

    # global vocab column index (also needed for the target one-hot)
    col = j * tv + lax.broadcasted_iota(jnp.int32, (tm, tv), 1)
    if mask_oob_cols:
        # STATIC gate: only emitted when V % tv_eff != 0 (ragged last vocab tile)
        logits = jnp.where(col < vocab_size, logits, _NEG_BIG)

    tgt = tgt_ref[...]                                # (tm, 1) int32

    # ---- online logsumexp update --------------------------------------------
    tile_max = jnp.max(logits, axis=-1, keepdims=True)            # (tm, 1)
    m_old = m_scr[...]
    m_new = jnp.maximum(m_old, tile_max)
    l_scr[...] = l_scr[...] * jnp.exp(m_old - m_new) + jnp.sum(
        jnp.exp(logits - m_new), axis=-1, keepdims=True)
    m_scr[...] = m_new

    # target logit via one-hot gather, accumulated over vocab tiles
    tl_scr[...] += jnp.sum(jnp.where(col == tgt, logits, 0.0),
                           axis=-1, keepdims=True)

    # ---- finalize at the last vocab step ------------------------------------
    @pl.when(j == nv - 1)
    def _():
        seg = seg_ref[...]                                        # (tm, 1) int32
        row = i * tm + lax.broadcasted_iota(jnp.int32, (tm, 1), 0)
        mask = (seg > 0) & (row < n_tokens)   # seg>0 select + ragged-tail mask

        lse = m_scr[...] + jnp.log(l_scr[...])
        nll = lse - tl_scr[...]                                   # -logprob[tgt]
        # target is a (possibly tied) argmax iff its logit equals the global max
        hit = (tl_scr[...] >= m_scr[...]).astype(jnp.float32)

        loss_p = jnp.sum(jnp.where(mask, nll, 0.0))
        corr_p = jnp.sum(jnp.where(mask, hit, 0.0))
        cnt_p = jnp.sum(mask.astype(jnp.float32))

        # pack the 3 partial sums into one lane-dense (1,1,128) row
        lane = lax.broadcasted_iota(jnp.int32, (1, 1, 128), 2)
        out_ref[...] = jnp.where(lane == 0, loss_p,
                       jnp.where(lane == 1, corr_p,
                       jnp.where(lane == 2, cnt_p, 0.0)))


def _round_up(a, b):
    return (a + b - 1) // b * b


def _chip_config():
    """Per-generation tile / VMEM defaults (falls back to conservative values)."""
    kind = ""
    try:
        kind = jax.devices()[0].device_kind.lower()
    except Exception:
        pass
    if "v5e" in kind or "v5 lite" in kind or "v5lite" in kind:
        return dict(name="v5e", tm=384, tv=256, vmem_cap=100 * 2**20, ncores=1, wbuf=3)
    if "v6" in kind:
        return dict(name="v6e", tm=1024, tv=256, vmem_cap=100 * 2**20, ncores=1, wbuf=3)
    if "v7" in kind or "7x" in kind:
        return dict(name="v7x", tm=512, tv=256, vmem_cap=52 * 2**20, ncores=2, wbuf=2)
    # v4 / v5p / unknown: conservative default
    return dict(name="tpu", tm=512, tv=256, vmem_cap=64 * 2**20, ncores=1, wbuf=2)


def _vmem_work(tm, tv, H, isz, wbuf):
    """Rough working-set estimate in bytes."""
    return (2 * tm * H * isz            # x double-buffer
            + wbuf * tv * H * isz       # weight buffers
            + 2 * tv * 4                # bias (f32) buffers
            + 2 * 2 * tm * 4            # tgt / seg buffers
            + 3 * tm * 4                # scratch m / l / tl
            + 2 * 128 * 4               # packed output block
            + 6 * tm * tv * 4)          # f32 (tm, tv) logits temporaries


def lm_target_forward(memory_bank, tgt, seg, weight, bias=None, *, tm=None, tv=None):
    """memory_bank: [B,S,H] (f32 or bf16), tgt/seg: [B,S] int, weight: [V,H], bias: [V]."""
    B, S, H = memory_bank.shape
    V = weight.shape[0]
    N = B * S

    dtype = memory_bank.dtype
    x = memory_bank.reshape(N, H)                 # no dtype cast (bf16 goes MXU-native)
    if weight.dtype != dtype:
        weight = weight.astype(dtype)
    if bias is None:
        bias = jnp.zeros((V,), jnp.float32)       # has_lmtarget_bias=False case
    bias2 = bias.reshape(1, V).astype(jnp.float32)

    cfg = _chip_config()
    tm = cfg["tm"] if tm is None else tm
    tv = cfg["tv"] if tv is None else tv
    wbuf = cfg["wbuf"]
    isz = jnp.dtype(dtype).itemsize

    # ---- vocab tile: whole vocab if small; otherwise prefer a lane-aligned
    # tile that divides V exactly so the OOB-column mask is never emitted. ----
    if V <= tv:
        tv_eff = V
    else:
        tv_eff = _round_up(tv, 128)
        if V % tv_eff != 0:
            for cand in (tv_eff, 384, 256, 128):
                if V % cand == 0:
                    tv_eff = cand
                    break
    nv = pl.cdiv(V, tv_eff)
    mask_oob_cols = (V % tv_eff != 0)

    # ---- token tile: multiple of 8 sublanes, chip-sized, never larger than
    # the 8-rounded token count; shrink until the working set fits VMEM. ------
    tm_eff = _round_up(min(tm, _round_up(N, 8)), 8)
    budget = int(cfg["vmem_cap"] * 0.85)
    while _vmem_work(tm_eff, tv_eff, H, isz, wbuf) > budget and tm_eff > 256:
        tm_eff = _round_up(max(tm_eff // 2, 8), 8)
    if _vmem_work(tm_eff, tv_eff, H, isz, wbuf) > budget and wbuf > 2:
        wbuf = 2

    # v7x: make sure both TensorCores get at least one token tile
    if cfg["ncores"] >= 2 and N > tm_eff:
        tm_eff = min(tm_eff, _round_up(pl.cdiv(N, 2), 8))

    nt = pl.cdiv(N, tm_eff)

    # tgt/seg are tiny int32 arrays; padding them to the tile grid is cheap.
    # The large activation `x` is NOT padded - its ragged tail is masked in-kernel.
    n_pad = nt * tm_eff
    tgt_f = tgt.reshape(N).astype(jnp.int32)
    seg_f = seg.reshape(N).astype(jnp.int32)
    if n_pad != N:
        tgt_f = jnp.pad(tgt_f, (0, n_pad - N))
        seg_f = jnp.pad(seg_f, (0, n_pad - N))
    tgt2 = tgt_f.reshape(n_pad, 1)
    seg2 = seg_f.reshape(n_pad, 1)

    work = _vmem_work(tm_eff, tv_eff, H, isz, wbuf)
    vmem_limit = int(min(cfg["vmem_cap"], max(32 * 2**20, int(1.5 * work))))

    cost = pl.CostEstimate(
        flops=2 * nt * tm_eff * nv * tv_eff * H,
        transcendentals=nt * tm_eff * nv * tv_eff,
        bytes_accessed=(nt * nv * tv_eff * H * isz   # weight stream (per token tile)
                        + N * H * isz                # activations
                        + V * 4 + 2 * n_pad * 4 + nt * 128 * 4),
    )

    kernel = functools.partial(_lm_target_kernel, n_tokens=N, vocab_size=V,
                               mask_oob_cols=mask_oob_cols)

    # weight stream: deepen buffering only when the grid is long enough and VMEM
    # budget allows (skipped on v7x); x keeps the default double buffer since its
    # block index is constant across the vocab axis.
    w_spec = pl.BlockSpec((tv_eff, H), lambda i, j: (j, 0))
    if wbuf > 2 and nt * nv >= 3:
        try:
            w_spec = pl.BlockSpec((tv_eff, H), lambda i, j: (j, 0),
                                  pipeline_mode=pl.Buffered(wbuf))
        except TypeError:
            pass  # older pallas: fall back to default double-buffering

    partials = pl.pallas_call(
        kernel,
        out_shape=jax.ShapeDtypeStruct((nt, 1, 128), jnp.float32),
        grid_spec=pltpu.PrefetchScalarGridSpec(
            num_scalar_prefetch=0,
            grid=(nt, nv),
            in_specs=[
                pl.BlockSpec((tm_eff, H), lambda i, j: (i, 0)),       # x tile
                w_spec,                                               # weight [V,H] tile
                pl.BlockSpec((1, tv_eff), lambda i, j: (0, j)),       # bias tile
                pl.BlockSpec((tm_eff, 1), lambda i, j: (i, 0)),       # tgt
                pl.BlockSpec((tm_eff, 1), lambda i, j: (i, 0)),       # seg
            ],
            out_specs=pl.BlockSpec((1, 1, 128), lambda i, j: (i, 0, 0)),
            scratch_shapes=[
                pltpu.VMEM((tm_eff, 1), jnp.float32),   # running max
                pltpu.VMEM((tm_eff, 1), jnp.float32),   # running sum-exp
                pltpu.VMEM((tm_eff, 1), jnp.float32),   # target logit
            ],
        ),
        compiler_params=pltpu.CompilerParams(
            dimension_semantics=("parallel", "arbitrary"),
            vmem_limit_bytes=vmem_limit),
        cost_estimate=cost,
    )(x, weight, bias2, tgt2, seg2)

    sums = jnp.sum(partials[:, 0, :], axis=0)       # (128,) ; lanes 0..2 used
    loss_sum, correct, count = sums[0], sums[1], sums[2]
    # NOTE: if no token has seg>0, loss = 0/0 -> NaN, matching torch NLLLoss on
    # an empty selection.
    loss = loss_sum / count                          # NLLLoss(reduction='mean')
    denominator = count + 1e-6
    return loss, correct, denominator


def _reference(memory_bank, tgt, seg, weight, bias):
    """Plain-JAX reference mirroring the torch code (eager boolean select)."""
    B, S, H = memory_bank.shape
    x = memory_bank.reshape(-1, H)
    t = tgt.reshape(-1)
    s = seg.reshape(-1)
    keep = s > 0
    x = x[keep]
    t = t[keep]
    logits = x @ weight.T + bias
    lp = jax.nn.log_softmax(logits, axis=-1)
    n = lp.shape[0]
    nll = -lp[jnp.arange(n), t]
    loss = nll.mean()
    correct = jnp.sum((jnp.argmax(lp, axis=-1) == t).astype(jnp.float32))
    denominator = n + 1e-6
    return loss, correct, denominator


if __name__ == "__main__":
    # synthetic config: hidden_size=32, vocab_size=512, has_lmtarget_bias=True,
    # label_smoothing=None, ignore_index=None
    B, S, H, V = 2, 8, 32, 512
    key = jax.random.PRNGKey(0)
    k1, k2, k3, k4, k5 = jax.random.split(key, 5)

    memory_bank = jax.random.normal(k1, (B, S, H), dtype=jnp.float32)
    tgt = jax.random.randint(k2, (B, S), 0, V, dtype=jnp.int32)
    seg = jax.random.randint(k3, (B, S), 0, 2, dtype=jnp.int32)
    seg = seg.at[0, 0].set(1)  # guarantee at least one predicted token

    # deterministic parameter init (nn.Linear(H, V, bias=True) shapes)
    weight = 0.02 * jax.random.normal(k4, (V, H), dtype=jnp.float32)
    bias = 0.01 * jax.random.normal(k5, (V,), dtype=jnp.float32)

    # f32 path: tight check against the f32 reference
    loss, correct, denom = lm_target_forward(memory_bank, tgt, seg, weight, bias)
    jax.block_until_ready((loss, correct, denom))

    ref_loss, ref_correct, ref_denom = _reference(memory_bank, tgt, seg, weight, bias)
    assert jnp.allclose(loss, ref_loss, rtol=1e-5, atol=1e-5), (loss, ref_loss)
    assert jnp.allclose(correct, ref_correct), (correct, ref_correct)
    assert jnp.allclose(denom, ref_denom), (denom, ref_denom)

    # bf16 path: MXU-native inputs with f32 accumulation (coarse sanity check)
    loss16, correct16, denom16 = lm_target_forward(
        memory_bank.astype(jnp.bfloat16), tgt, seg,
        weight.astype(jnp.bfloat16), bias)
    jax.block_until_ready((loss16, correct16, denom16))
    assert bool(jnp.isfinite(loss16)) and abs(float(loss16) - float(ref_loss)) < 5e-2
    assert jnp.allclose(denom16, ref_denom)

    print("KERNEL_OK")
</pallas_src>

<mosaic_0001>
module attributes {stable_mosaic.version = 11 : i64} {
  func.func @_lm_target_kernel(%arg0: i32, %arg1: i32, %arg2: memref<16x32xf32, #tpu.memory_space<vmem>>, %arg3: memref<256x32xf32, #tpu.memory_space<vmem>>, %arg4: memref<1x256xf32, #tpu.memory_space<vmem>>, %arg5: memref<16x1xi32, #tpu.memory_space<vmem>>, %arg6: memref<16x1xi32, #tpu.memory_space<vmem>>, %arg7: memref<1x1x128xf32, #tpu.memory_space<vmem>>, %arg8: memref<16x1xf32, #tpu.memory_space<vmem>>, %arg9: memref<16x1xf32, #tpu.memory_space<vmem>>, %arg10: memref<16x1xf32, #tpu.memory_space<vmem>>) attributes {dimension_semantics = [#tpu.dimension_semantics<parallel>, #tpu.dimension_semantics<arbitrary>], iteration_bounds = array<i64: 1, 2>, scalar_prefetch = 0 : i64, scratch_operands = 3 : i64, tpu.core_type = #tpu.core_type<tc>, window_params = [{transform_indices = @transform_0, window_bounds = array<i64: 16, 32>}, {transform_indices = @transform_1, window_bounds = array<i64: 256, 32>}, {transform_indices = @transform_2, window_bounds = array<i64: 1, 256>}, {transform_indices = @transform_3, window_bounds = array<i64: 16, 1>}, {transform_indices = @transform_4, window_bounds = array<i64: 16, 1>}, {transform_indices = @transform_5, window_bounds = array<i64: 1, 1, 128>}]} {
    %c0_i32 = arith.constant 0 : i32
    %0 = arith.cmpi eq, %arg1, %c0_i32 : i32
    %1 = arith.extui %0 : i1 to i32
    %c0_i32_0 = arith.constant 0 : i32
    %2 = arith.cmpi ne, %1, %c0_i32_0 : i32
    scf.if %2 {
      %cst_25 = arith.constant -1.000000e+30 : f32
      %42 = vector.broadcast %cst_25 : f32 to vector<16x1xf32>
      %c0_26 = arith.constant 0 : index
      %c0_27 = arith.constant 0 : index
      %43 = vector.load %arg8[%c0_26, %c0_27] : memref<16x1xf32, #tpu.memory_space<vmem>>, vector<16x1xf32>
      tpu.vector_store %arg8[%c0_26, %c0_27], %42 {strides = array<i32>} : memref<16x1xf32, #tpu.memory_space<vmem>>, vector<16x1xf32>,
      %cst_28 = arith.constant 0.000000e+00 : f32
      %44 = vector.broadcast %cst_28 : f32 to vector<16x1xf32>
      %c0_29 = arith.constant 0 : index
      %c0_30 = arith.constant 0 : index
      %45 = vector.load %arg9[%c0_29, %c0_30] : memref<16x1xf32, #tpu.memory_space<vmem>>, vector<16x1xf32>
      tpu.vector_store %arg9[%c0_29, %c0_30], %44 {strides = array<i32>} : memref<16x1xf32, #tpu.memory_space<vmem>>, vector<16x1xf32>,
      %cst_31 = arith.constant 0.000000e+00 : f32
      %46 = vector.broadcast %cst_31 : f32 to vector<16x1xf32>
      %c0_32 = arith.constant 0 : index
      %c0_33 = arith.constant 0 : index
      %47 = vector.load %arg10[%c0_32, %c0_33] : memref<16x1xf32, #tpu.memory_space<vmem>>, vector<16x1xf32>
      tpu.vector_store %arg10[%c0_32, %c0_33], %46 {strides = array<i32>} : memref<16x1xf32, #tpu.memory_space<vmem>>, vector<16x1xf32>,
    } else {
    }
    %c0 = arith.constant 0 : index
    %c0_1 = arith.constant 0 : index
    %3 = vector.load %arg2[%c0, %c0_1] : memref<16x32xf32, #tpu.memory_space<vmem>>, vector<16x32xf32>
    %c0_2 = arith.constant 0 : index
    %c0_3 = arith.constant 0 : index
    %4 = vector.load %arg3[%c0_2, %c0_3] : memref<256x32xf32, #tpu.memory_space<vmem>>, vector<256x32xf32>
    %cst = arith.constant dense<0.000000e+00> : vector<16x256xf32>
    %5 = tpu.matmul %3, %4, %cst {dimension_numbers = #tpu.dot_dimension_numbers<[1], [1], [0], [0], [0, 0, 1, 0], [], []>} : vector<16x32xf32>, vector<256x32xf32>, vector<16x256xf32> -> vector<16x256xf32>
    %c0_4 = arith.constant 0 : index
    %c0_5 = arith.constant 0 : index
    %6 = vector.load %arg4[%c0_4, %c0_5] : memref<1x256xf32, #tpu.memory_space<vmem>>, vector<1x256xf32>
    %7 = vector.broadcast %6 : vector<1x256xf32> to vector<16x256xf32>
    %8 = arith.addf %5, %7 : vector<16x256xf32>
    %c256_i32 = arith.constant 256 : i32
    %9 = arith.muli %arg1, %c256_i32 : i32
    %10 = tpu.iota {dimensions = array<i32: 1>} : vector<16x256xi32>
    %11 = vector.broadcast %9 : i32 to vector<16x256xi32>
    %12 = arith.addi %11, %10 : vector<16x256xi32>
    %c0_6 = arith.constant 0 : index
    %c0_7 = arith.constant 0 : index
    %13 = vector.load %arg5[%c0_6, %c0_7] : memref<16x1xi32, #tpu.memory_space<vmem>>, vector<16x1xi32>
    %cst_8 = arith.constant dense<0xFF800000> : vector<16xf32>
    %14 = vector.multi_reduction <maximumf>, %8, %cst_8 [1] : vector<16x256xf32> to vector<16xf32>
    %15 = vector.shape_cast %14 : vector<16xf32> to vector<16x1xf32>
    %c0_9 = arith.constant 0 : index
    %c0_10 = arith.constant 0 : index
    %16 = vector.load %arg8[%c0_9, %c0_10] : memref<16x1xf32, #tpu.memory_space<vmem>>, vector<16x1xf32>
    %17 = arith.maximumf %16, %15 : vector<16x1xf32>
    %c0_11 = arith.constant 0 : index
    %c0_12 = arith.constant 0 : index
    %18 = vector.load %arg9[%c0_11, %c0_12] : memref<16x1xf32, #tpu.memory_space<vmem>>, vector<16x1xf32>
    %19 = arith.subf %16, %17 : vector<16x1xf32>
    %20 = math.exp %19 : vector<16x1xf32>
    %21 = arith.mulf %18, %20 : vector<16x1xf32>
    %22 = vector.broadcast %17 : vector<16x1xf32> to vector<16x256xf32>
    %23 = arith.subf %8, %22 : vector<16x256xf32>
    %24 = math.exp %23 : vector<16x256xf32>
    %cst_13 = arith.constant dense<0.000000e+00> : vector<16xf32>
    %25 = vector.multi_reduction <add>, %24, %cst_13 [1] : vector<16x256xf32> to vector<16xf32>
    %26 = vector.shape_cast %25 : vector<16xf32> to vector<16x1xf32>
    %27 = arith.addf %21, %26 : vector<16x1xf32>
    %c0_14 = arith.constant 0 : index
    %c0_15 = arith.constant 0 : index
    %28 = vector.load %arg9[%c0_14, %c0_15] : memref<16x1xf32, #tpu.memory_space<vmem>>, vector<16x1xf32>
    tpu.vector_store %arg9[%c0_14, %c0_15], %27 {strides = array<i32>} : memref<16x1xf32, #tpu.memory_space<vmem>>, vector<16x1xf32>,
    %c0_16 = arith.constant 0 : index
    %c0_17 = arith.constant 0 : index
    %29 = vector.load %arg8[%c0_16, %c0_17] : memref<16x1xf32, #tpu.memory_space<vmem>>, vector<16x1xf32>
    tpu.vector_store %arg8[%c0_16, %c0_17], %17 {strides = array<i32>} : memref<16x1xf32, #tpu.memory_space<vmem>>, vector<16x1xf32>,
    %c0_18 = arith.constant 0 : index
    %c0_19 = arith.constant 0 : index
    %30 = vector.load %arg10[%c0_18, %c0_19] : memref<16x1xf32, #tpu.memory_space<vmem>>, vector<16x1xf32>
    %31 = vector.broadcast %13 : vector<16x1xi32> to vector<16x256xi32>
    %32 = arith.cmpi eq, %12, %31 : vector<16x256xi32>
    %cst_20 = arith.constant 0.000000e+00 : f32
    %33 = vector.broadcast %cst_20 : f32 to vector<16x256xf32>
    %34 = arith.select %32, %8, %33 : vector<16x256xi1>, vector<16x256xf32>
    %cst_21 = arith.constant dense<0.000000e+00> : vector<16xf32>
    %35 = vector.multi_reduction <add>, %34, %cst_21 [1] : vector<16x256xf32> to vector<16xf32>
    %36 = vector.shape_cast %35 : vector<16xf32> to vector<16x1xf32>
    %37 = arith.addf %30, %36 : vector<16x1xf32>
    %c0_22 = arith.constant 0 : index
    %c0_23 = arith.constant 0 : index
    %38 = vector.load %arg10[%c0_22, %c0_23] : memref<16x1xf32, #tpu.memory_space<vmem>>, vector<16x1xf32>
    tpu.vector_store %arg10[%c0_22, %c0_23], %37 {strides = array<i32>} : memref<16x1xf32, #tpu.memory_space<vmem>>, vector<16x1xf32>,
    %c1_i32 = arith.constant 1 : i32
    %39 = arith.cmpi eq, %arg1, %c1_i32 : i32
    %40 = arith.extui %39 : i1 to i32
    %c0_i32_24 = arith.constant 0 : i32
    %41 = arith.cmpi ne, %40, %c0_i32_24 : i32
    scf.if %41 {
      %c0_25 = arith.constant 0 : index
      %c0_26 = arith.constant 0 : index
      %42 = vector.load %arg6[%c0_25, %c0_26] : memref<16x1xi32, #tpu.memory_space<vmem>>, vector<16x1xi32>
      %c16_i32 = arith.constant 16 : i32
      %43 = arith.muli %arg0, %c16_i32 : i32
      %44 = tpu.iota {dimensions = array<i32: 0>} : vector<16x1xi32>
      %45 = vector.broadcast %43 : i32 to vector<16x1xi32>
      %46 = arith.addi %45, %44 : vector<16x1xi32>
      %c0_i32_27 = arith.constant 0 : i32
      %47 = vector.broadcast %c0_i32_27 : i32 to vector<16x1xi32>
      %48 = arith.cmpi sgt, %42, %47 : vector<16x1xi32>
      %c16_i32_28 = arith.constant 16 : i32
      %49 = vector.broadcast %c16_i32_28 : i32 to vector<16x1xi32>
      %50 = arith.cmpi slt, %46, %49 : vector<16x1xi32>
      %51 = arith.andi %48, %50 : vector<16x1xi1>
      %c0_29 = arith.constant 0 : index
      %c0_30 = arith.constant 0 : index
      %52 = vector.load %arg8[%c0_29, %c0_30] : memref<16x1xf32, #tpu.memory_space<vmem>>, vector<16x1xf32>
      %c0_31 = arith.constant 0 : index
      %c0_32 = arith.constant 0 : index
      %53 = vector.load %arg9[%c0_31, %c0_32] : memref<16x1xf32, #tpu.memory_space<vmem>>, vector<16x1xf32>
      %54 = math.log %53 : vector<16x1xf32>
      %55 = arith.addf %52, %54 : vector<16x1xf32>
      %c0_33 = arith.constant 0 : index
      %c0_34 = arith.constant 0 : index
      %56 = vector.load %arg10[%c0_33, %c0_34] : memref<16x1xf32, #tpu.memory_space<vmem>>, vector<16x1xf32>
      %57 = arith.subf %55, %56 : vector<16x1xf32>
      %c0_35 = arith.constant 0 : index
      %c0_36 = arith.constant 0 : index
      %58 = vector.load %arg10[%c0_35, %c0_36] : memref<16x1xf32, #tpu.memory_space<vmem>>, vector<16x1xf32>
      %c0_37 = arith.constant 0 : index
      %c0_38 = arith.constant 0 : index
      %59 = vector.load %arg8[%c0_37, %c0_38] : memref<16x1xf32, #tpu.memory_space<vmem>>, vector<16x1xf32>
      %60 = arith.cmpf oge, %58, %59 : vector<16x1xf32>
      %61 = arith.extui %60 : vector<16x1xi1> to vector<16x1xi32>
      %62 = arith.sitofp %61 : vector<16x1xi32> to vector<16x1xf32>
      %cst_39 = arith.constant 0.000000e+00 : f32
      %63 = vector.broadcast %cst_39 : f32 to vector<16x1xf32>
      %64 = arith.select %51, %57, %63 : vector<16x1xi1>, vector<16x1xf32>
      %65 = vector.shape_cast %64 : vector<16x1xf32> to vector<1x16x1xf32>
      %cst_40 = arith.constant dense<0.000000e+00> : vector<1xf32>
      %66 = vector.multi_reduction <add>, %65, %cst_40 [1, 2] : vector<1x16x1xf32> to vector<1xf32>
      %67 = vector.shape_cast %66 : vector<1xf32> to vector<1x1x1xf32>
      %68 = vector.extract %67[0, 0, 0] : f32 from vector<1x1x1xf32>
      %cst_41 = arith.constant 0.000000e+00 : f32
      %69 = vector.broadcast %cst_41 : f32 to vector<16x1xf32>
      %70 = arith.select %51, %62, %69 : vector<16x1xi1>, vector<16x1xf32>
      %71 = vector.shape_cast %70 : vector<16x1xf32> to vector<1x16x1xf32>
      %cst_42 = arith.constant dense<0.000000e+00> : vector<1xf32>
      %72 = vector.multi_reduction <add>, %71, %cst_42 [1, 2] : vector<1x16x1xf32> to vector<1xf32>
      %73 = vector.shape_cast %72 : vector<1xf32> to vector<1x1x1xf32>
      %74 = vector.extract %73[0, 0, 0] : f32 from vector<1x1x1xf32>
      %75 = arith.extui %51 : vector<16x1xi1> to vector<16x1xi32>
      %76 = arith.sitofp %75 : vector<16x1xi32> to vector<16x1xf32>
      %77 = vector.shape_cast %76 : vector<16x1xf32> to vector<1x16x1xf32>
      %cst_43 = arith.constant dense<0.000000e+00> : vector<1xf32>
      %78 = vector.multi_reduction <add>, %77, %cst_43 [1, 2] : vector<1x16x1xf32> to vector<1xf32>
      %79 = vector.shape_cast %78 : vector<1xf32> to vector<1x1x1xf32>
      %80 = vector.extract %79[0, 0, 0] : f32 from vector<1x1x1xf32>
      %81 = tpu.iota {dimensions = array<i32: 2>} : vector<1x1x128xi32>
      %c0_i32_44 = arith.constant 0 : i32
      %82 = vector.broadcast %c0_i32_44 : i32 to vector<1x1x128xi32>
      %83 = arith.cmpi eq, %81, %82 : vector<1x1x128xi32>
      %c1_i32_45 = arith.constant 1 : i32
      %84 = vector.broadcast %c1_i32_45 : i32 to vector<1x1x128xi32>
      %85 = arith.cmpi eq, %81, %84 : vector<1x1x128xi32>
      %c2_i32 = arith.constant 2 : i32
      %86 = vector.broadcast %c2_i32 : i32 to vector<1x1x128xi32>
      %87 = arith.cmpi eq, %81, %86 : vector<1x1x128xi32>
      %cst_46 = arith.constant 0.000000e+00 : f32
      %88 = vector.broadcast %80 : f32 to vector<1x1x128xf32>
      %89 = vector.broadcast %cst_46 : f32 to vector<1x1x128xf32>
      %90 = arith.select %87, %88, %89 : vector<1x1x128xi1>, vector<1x1x128xf32>
      %91 = vector.broadcast %74 : f32 to vector<1x1x128xf32>
      %92 = arith.select %85, %91, %90 : vector<1x1x128xi1>, vector<1x1x128xf32>
      %93 = vector.broadcast %68 : f32 to vector<1x1x128xf32>
      %94 = arith.select %83, %93, %92 : vector<1x1x128xi1>, vector<1x1x128xf32>
      %c0_47 = arith.constant 0 : index
      %c0_48 = arith.constant 0 : index
      %c0_49 = arith.constant 0 : index
      %95 = vector.load %arg7[%c0_47, %c0_48, %c0_49] : memref<1x1x128xf32, #tpu.memory_space<vmem>>, vector<1x1x128xf32>
      tpu.vector_store %arg7[%c0_47, %c0_48, %c0_49], %94 {strides = array<i32>} : memref<1x1x128xf32, #tpu.memory_space<vmem>>, vector<1x1x128xf32>,
    } else {
    }
    return
  }
  func.func @transform_0(%arg0: i32, %arg1: i32) -> (i32, i32) {
    %c0_i32 = arith.constant 0 : i32
    %c0_i32_0 = arith.constant 0 : i32
    return %arg0, %c0_i32 : i32, i32
  }
  func.func @transform_1(%arg0: i32, %arg1: i32) -> (i32, i32) {
    %c0_i32 = arith.constant 0 : i32
    %c0_i32_0 = arith.constant 0 : i32
    return %arg1, %c0_i32 : i32, i32
  }
  func.func @transform_2(%arg0: i32, %arg1: i32) -> (i32, i32) {
    %c0_i32 = arith.constant 0 : i32
    %c0_i32_0 = arith.constant 0 : i32
    return %c0_i32, %arg1 : i32, i32
  }
  func.func @transform_3(%arg0: i32, %arg1: i32) -> (i32, i32) {
    %c0_i32 = arith.constant 0 : i32
    %c0_i32_0 = arith.constant 0 : i32
    return %arg0, %c0_i32 : i32, i32
  }
  func.func @transform_4(%arg0: i32, %arg1: i32) -> (i32, i32) {
    %c0_i32 = arith.constant 0 : i32
    %c0_i32_0 = arith.constant 0 : i32
    return %arg0, %c0_i32 : i32, i32
  }
  func.func @transform_5(%arg0: i32, %arg1: i32) -> (i32, i32, i32) {
    %c0_i32 = arith.constant 0 : i32
    %c0_i32_0 = arith.constant 0 : i32
    %c0_i32_1 = arith.constant 0 : i32
    return %arg0, %c0_i32, %c0_i32_0 : i32, i32, i32
  }
}

</mosaic_0001>

<bundles_post_ra>
// kernel: tpu_custom_call.1
= control target key start
LH: loop header
LB: loop body
LE: loop exit
PB: predicated region body
PF: predicated region fallthrough
CT: control target
= control target key end

     0   :  { %10 = vsyncpa [#allocation6], 0  ;;  %s1151_s18 = smov 0   ;;  %s1153_s19 = smov 0   ;;  %s1387_s0 = inlined_call_operand.vmem [shape: f32[16,32], index: 0, kind: input, shape index: {}]   ;;  %s1388_s1 = inlined_call_operand.vmem [shape: f32[512,32], index: 1, kind: input, shape index: {}]   ;;  %s1389_s2 = inlined_call_operand.vmem [shape: f32[1,512], index: 2, kind: input, shape index: {}]   ;;  %s1390_s3 = inlined_call_operand.vmem [shape: s32[16,1], index: 3, kind: input, shape index: {}]   ;;  %s1391_s4 = inlined_call_operand.vmem [shape: s32[16,1], index: 4, kind: input, shape index: {}]   ;;  %s1392_s5 = inlined_call_operand.hbm [shape: f32[1,1,128], index: 5, kind: output, shape index: {}]  }
   0x1   :  { %s1155_s20 = smov 0  }
   0x2 LB: > { %s848_s21 = sadd.s32 4294967295, %s1114_s20   ;;  %s25_s22 = sadd.s32 1, %s1110_s19  ;;  %s1114_s20 = sphi %s1155_s20, %s16_s20   ;;  %s1110_s19 = sphi %s1153_s19, %s1397_s19   ;;  %s1106_s18 = sphi %s1151_s18, %s1396_s18  }
   0x3   : > { %p26_p0 = scmp.ge.s32.totalorder %s25_s22, 2  ;;  %p854_p1 = scmp.ge.s32.totalorder %s1114_s20, 1 }
   0x4   : > { %p244_p2 = scmp.lt.s32.totalorder %s1114_s20, 3 }
   0x5   : > { %s1399_s22 = smov (%p26_p0, %s25_s22), 0 }
   0x6   : > { %p245_p3 = pnand %p854_p1, %p244_p2 }
   0x7   : > { %s855_s23 = sshll.u32 (!%p245_p3), %s1106_s18, 5  ;;  %s857_s24 = sshll.u32 (!%p245_p3), %s1106_s18, 1 }
   0x8   : > { %248 = sbr.rel (%p245_p3) target bundleno = 1014 (0x3f6), region = 40  ;;  %p293_p4 = scmp.lt.s32.totalorder (!%p245_p3), %s855_s23, 63 }
   0x9   : > { %p299_p5 = scmp.lt.s32.totalorder (!%p245_p3), %s857_s24, 3  ;;  %p858_p6 = scmp.ne.s32.totalorder (!%p245_p3), %s1106_s18, 0 }
   0xf   : > { %s1401_s23 = smov (!%p293_p4, %s855_s23), 63  ;;  %s1403_s24 = smov (!%p299_p5, %s857_s24), 3 }
  0x10   : > { %s856_s25 = sshll.u32 %s1401_s23, 3  ;;  %s301_s6 = scalar_lea.vmem %s1389_s2, %s1403_s24  ;;  %vm319_vm0 = vcmask (!%p858_p6), 7168   ;;  %v1116_v0 = vmov (!%p858_p6), -1e+30   ;;  %v1117_v1 = vmov (!%p858_p6), 0.0  }
  0x11   : > { %s1179_s28 = scalar_lea.vmem %s1388_s1, %s856_s25  ;;  %318 = sbr.rel (%p858_p6) target bundleno = 24 (0x18), region = 44  ;;  %320 = vst.msk [vmem:[#allocation2] sm:$0xff] (!%p858_p6), %vm319_vm0, %v1116_v0  ;;  %321 = vst.msk [vmem:[#allocation2 + $0x8] sm:$0xff] (!%p858_p6), %vm319_vm0, %v1116_v0 }
  0x12   : > { %322 = vst.msk [vmem:[#allocation3] sm:$0xff] (!%p858_p6), %vm319_vm0, %v1117_v1  ;;  %323 = vst.msk [vmem:[#allocation3 + $0x8] sm:$0xff] (!%p858_p6), %vm319_vm0, %v1117_v1 }
  0x13   : > { %324 = vst.msk [vmem:[#allocation4] sm:$0xff] (!%p858_p6), %vm319_vm0, %v1117_v1  ;;  %325 = vst.msk [vmem:[#allocation4 + $0x8] sm:$0xff] (!%p858_p6), %vm319_vm0, %v1117_v1 }
  0x18 PF: > { %v344_v2 = vld [vmem:[%s1179_s28 + $0x80] sm:$0xff]  ;;  %v345_v3 = vld [vmem:[%s1179_s28 + $0x88] sm:$0xff]  ;;  %vm372_vm1 = vcmask 261120   ;;  %v346_v8 = vld [vmem:[%s1179_s28 + $0x90] sm:$0xff]  ;;  %v1118_v53 = vmov 0   ;;  %v362_v54 = vlaneseq  ;;  %vm611_vm3 = vcmask 7168  }
  0x19   : > { %v328_v4 = vld [vmem:[%s1179_s28] sm:$0xff]  ;;  %v939_v5 = vpack.c.bf16 %v345_v3, %v344_v2  ;;  %vm1191_vm2 = vmpackc.low %vm372_vm1, %vm372_vm1  ;;  %v329_v7 = vld [vmem:[%s1179_s28 + $0x8] sm:$0xff]  ;;  %1045 = vset.pattern.permute.xlu0 %v1118_v53  ;;  %1044 = vset.pattern.permute.xlu1 %v1118_v53  ;;  %s893_s15 = sshll.u32 %s1106_s18, 8  ;;  %p894_p7 = scmp.ne.s32.totalorder %s1106_s18, 1 }
  0x1a   : > { %v942_v9 = vpack.c.bf16 %v329_v7, %v328_v4  ;;  %v347_v10 = vld [vmem:[%s1179_s28 + $0x98] sm:$0xff]  ;;  %v330_v12 = vld [vmem:[%s1179_s28 + $0x10] sm:$0xff]  ;;  %v348_v14 = vld [vmem:[%s1179_s28 + $0xa0] sm:$0xff]  ;;  %v363_v55 = vshrl.u32 %v362_v54, 7 }
  0x1b   : > { %941 = vmatprep.subr.msk.bf16.mxu0 %vm1191_vm2, %v939_v5  ;;  %987 = vmatprep.subr.msk.bf16.mxu1 %vm1191_vm2, %v939_v5  ;;  %v945_v11 = vpack.c.bf16 %v347_v10, %v346_v8  ;;  %v331_v13 = vld [vmem:[%s1179_s28 + $0x18] sm:$0xff]  ;;  %v349_v15 = vld [vmem:[%s1179_s28 + $0xa8] sm:$0xff]  ;;  %v1217_v18 = vld [vmem:[%s1387_s0] sm:$0xff] }
  0x1c   : > { %944 = vmatpush3.bf16.xpose.msk.msra.mxu0 %vm1191_vm2, %v942_v9  ;;  %995 = vmatpush3.bf16.xpose.msk.msra.mxu1 %vm1191_vm2, %v942_v9  ;;  %v948_v16 = vpack.c.bf16 %v331_v13, %v330_v12  ;;  %v951_v17 = vpack.c.bf16 %v349_v15, %v348_v14  ;;  %v1222_v19 = vld [vmem:[%s1387_s0 + $0x8] sm:$0xff]  ;;  %v332_v20 = vld [vmem:[%s1179_s28 + $0x20] sm:$0xff]  ;;  %v350_v22 = vld [vmem:[%s1179_s28 + $0xb0] sm:$0xff]  ;;  %v364_v56 = vsub.s32 0, %v363_v55  ;;  %v368_v58 = vsub.s32 1, %v363_v55 }
  0x1d   : > { %947 = vmatprep.subr.msk.bf16.mxu0 %vm1191_vm2, %v945_v11  ;;  %988 = vmatprep.subr.msk.bf16.mxu1 %vm1191_vm2, %v945_v11  ;;  %v333_v21 = vld [vmem:[%s1179_s28 + $0x28] sm:$0xff]  ;;  %v351_v23 = vld [vmem:[%s1179_s28 + $0xb8] sm:$0xff]  ;;  %v334_v26 = vld [vmem:[%s1179_s28 + $0x30] sm:$0xff]  ;;  %v1314_v11 = vand.u32 127, %v362_v54 }
  0x1e   : > { %935 = vmatprep.mubr.msk.f32.mxu0 %vm372_vm1, %v1217_v18  ;;  %937 = vmatprep.mubr.msk.f32.mxu1 %vm372_vm1, %v1222_v19  ;;  %v954_v24 = vpack.c.bf16 %v333_v21, %v332_v20  ;;  %v957_v25 = vpack.c.bf16 %v351_v23, %v350_v22  ;;  %v335_v27 = vld [vmem:[%s1179_s28 + $0x38] sm:$0xff]  ;;  %v352_v28 = vld [vmem:[%s1179_s28 + $0xc0] sm:$0xff]  ;;  %v353_v29 = vld [vmem:[%s1179_s28 + $0xc8] sm:$0xff] }
  0x1f   : > { %v960_v30 = vpack.c.bf16 %v335_v27, %v334_v26  ;;  %v963_v31 = vpack.c.bf16 %v353_v29, %v352_v28  ;;  %v336_v32 = vld [vmem:[%s1179_s28 + $0x40] sm:$0xff]  ;;  %v337_v33 = vld [vmem:[%s1179_s28 + $0x48] sm:$0xff]  ;;  %v354_v34 = vld [vmem:[%s1179_s28 + $0xd0] sm:$0xff]  ;;  %vm727_vm12 = vcmp.eq.s32.totalorder (!%p894_p7), %v1314_v11, 2  ;;  %vm726_vm13 = vcmp.eq.s32.totalorder (!%p894_p7), %v1314_v11, 1 }
  0x20   : > { %v355_v35 = vld [vmem:[%s1179_s28 + $0xd8] sm:$0xff]  ;;  %v966_v36 = vpack.c.bf16 %v337_v33, %v336_v32  ;;  %v338_v38 = vld [vmem:[%s1179_s28 + $0x50] sm:$0xff]  ;;  %v356_v40 = vld [vmem:[%s1179_s28 + $0xe0] sm:$0xff]  ;;  %vm725_vm14 = vcmp.eq.s32.totalorder (!%p894_p7), %v1314_v11, 0 }
  0x21   : > { %v969_v37 = vpack.c.bf16 %v355_v35, %v354_v34  ;;  %v339_v39 = vld [vmem:[%s1179_s28 + $0x58] sm:$0xff]  ;;  %v357_v41 = vld [vmem:[%s1179_s28 + $0xe8] sm:$0xff]  ;;  %v340_v44 = vld [vmem:[%s1179_s28 + $0x60] sm:$0xff] }
  0x22   : > { %v972_v42 = vpack.c.bf16 %v339_v39, %v338_v38  ;;  %v975_v43 = vpack.c.bf16 %v357_v41, %v356_v40  ;;  %v341_v45 = vld [vmem:[%s1179_s28 + $0x68] sm:$0xff]  ;;  %v358_v46 = vld [vmem:[%s1179_s28 + $0xf0] sm:$0xff]  ;;  %v359_v47 = vld [vmem:[%s1179_s28 + $0xf8] sm:$0xff] }
  0x23   : > { %v978_v48 = vpack.c.bf16 %v341_v45, %v340_v44  ;;  %v981_v49 = vpack.c.bf16 %v359_v47, %v358_v46  ;;  %v342_v50 = vld [vmem:[%s1179_s28 + $0x70] sm:$0xff]  ;;  %v343_v51 = vld [vmem:[%s1179_s28 + $0x78] sm:$0xff]  ;;  %v360_v57 = vld [vmem:[%s301_s6] sm:$0x3] }
  0x24   : > { %950 = vmatpush3.bf16.xpose.msk.msra.mxu0 %vm1191_vm2, %v948_v16  ;;  %996 = vmatpush3.bf16.xpose.msk.msra.mxu1 %vm1191_vm2, %v948_v16  ;;  %v984_v52 = vpack.c.bf16 %v343_v51, %v342_v50  ;;  %v365_v59 = vrot.slane %v360_v57, %v364_v56  ;;  %v369_v60 = vrot.slane %v360_v57, %v368_v58  ;;  %v559_v7 = vld [vmem:[%s1390_s3] sm:$0xff]  ;;  %v568_v12 = vld [vmem:[#allocation2 + $0x8] sm:$0xff]  ;;  %v555_v16 = vadd.s32 128, %v1314_v11  ;;  %v572_v56 = vld [vmem:[#allocation3 + $0x8] sm:$0xff] }
  0x25   : > { %953 = vmatprep.subr.msk.bf16.mxu0 %vm1191_vm2, %v951_v17  ;;  %989 = vmatprep.subr.msk.bf16.mxu1 %vm1191_vm2, %v951_v17  ;;  %v567_v8 = vld [vmem:[#allocation2] sm:$0xff]  ;;  %v556_v17 = vstv %s893_s15 }
  0x26   : > { %v557_v20 = vadd.s32 %v556_v17, %v1314_v11  ;;  %v558_v21 = vadd.s32 %v556_v17, %v555_v16  ;;  %v616_v46 = vld [vmem:[#allocation4] sm:$0xff] }
  0x2c   : > { %956 = vmatpush3.bf16.xpose.msk.msra.mxu0 %vm1191_vm2, %v954_v24  ;;  %997 = vmatpush3.bf16.xpose.msk.msra.mxu1 %vm1191_vm2, %v954_v24 }
  0x2d   : > { %959 = vmatprep.subr.msk.bf16.mxu0 %vm1191_vm2, %v957_v25  ;;  %990 = vmatprep.subr.msk.bf16.mxu1 %vm1191_vm2, %v957_v25 }
  0x34   : > { %962 = vmatpush3.bf16.xpose.msk.msra.mxu0 %vm1191_vm2, %v960_v30  ;;  %998 = vmatpush3.bf16.xpose.msk.msra.mxu1 %vm1191_vm2, %v960_v30 }
  0x35   : > { %965 = vmatprep.subr.msk.bf16.mxu0 %vm1191_vm2, %v963_v31  ;;  %991 = vmatprep.subr.msk.bf16.mxu1 %vm1191_vm2, %v963_v31 }
  0x3c   : > { %968 = vmatpush3.bf16.xpose.msk.msra.mxu0 %vm1191_vm2, %v966_v36  ;;  %999 = vmatpush3.bf16.xpose.msk.msra.mxu1 %vm1191_vm2, %v966_v36 }
  0x3d   : > { %971 = vmatprep.subr.msk.bf16.mxu0 %vm1191_vm2, %v969_v37  ;;  %992 = vmatprep.subr.msk.bf16.mxu1 %vm1191_vm2, %v969_v37 }
  0x44   : > { %974 = vmatpush3.bf16.xpose.msk.msra.mxu0 %vm1191_vm2, %v972_v42  ;;  %1000 = vmatpush3.bf16.xpose.msk.msra.mxu1 %vm1191_vm2, %v972_v42 }
  0x45   : > { %977 = vmatprep.subr.msk.bf16.mxu0 %vm1191_vm2, %v975_v43  ;;  %993 = vmatprep.subr.msk.bf16.mxu1 %vm1191_vm2, %v975_v43 }
  0x4c   : > { %980 = vmatpush3.bf16.xpose.msk.msra.mxu0 %vm1191_vm2, %v978_v48  ;;  %1001 = vmatpush3.bf16.xpose.msk.msra.mxu1 %vm1191_vm2, %v978_v48 }
  0x4d   : > { %983 = vmatprep.subr.msk.bf16.mxu0 %vm1191_vm2, %v981_v49  ;;  %994 = vmatprep.subr.msk.bf16.mxu1 %vm1191_vm2, %v981_v49 }
  0x54   : > { %986 = vmatpush3.bf16.xpose.msk.msra.mxu0 %vm1191_vm2, %v984_v52  ;;  %1002 = vmatpush3.bf16.xpose.msk.msra.mxu1 %vm1191_vm2, %v984_v52  ;;  %v571_v52 = vld [vmem:[#allocation3] sm:$0xff] }
  0x5b   : > { %936 = vmatmul.mubr.msk.f32.vlgmr.msra.gmra.mrb[0].mxu0 %vm372_vm1, %v1217_v18  ;;  %938 = vmatmul.mubr.msk.f32.vlgmr.msra.gmra.mrb[0].mxu1 %vm372_vm1, %v1222_v19  ;;  %v560_v19 = vld [vmem:[%s1390_s3 + $0x8] sm:$0xff] }
 0x12e   : > { %v541_v61 = vpop.f32.mrb[0].mxu0  ;;  %v547_v62 = vpop.f32.mrb[0].mxu1 }
 0x12f   : > { %v542_v63 = vadd.f32 %v541_v61, %v365_v59  ;;  %v543_v0 = vpop.f32.mrb[1].mxu0  ;;  %v549_v1 = vpop.f32.mrb[1].mxu1  ;;  %v548_v3 = vadd.f32 %v547_v62, %v365_v59  ;;  %v617_v61 = vld [vmem:[#allocation4 + $0x8] sm:$0xff] }
 0x130   : > { %v544_v2 = vadd.f32 %v543_v0, %v369_v60  ;;  %v550_v4 = vadd.f32 %v549_v1, %v369_v60  ;;  %v646_v0 = vld [vmem:[%s1391_s4] sm:$0xff] (!%p894_p7)  ;;  %v647_v1 = vld [vmem:[%s1391_s4 + $0x8] sm:$0xff] (!%p894_p7) }
 0x131   : > { %vm655_vm8 = vcmp.gt.s32.totalorder (!%p894_p7), %v646_v0, 0  ;;  %vm656_vm9 = vcmp.gt.s32.totalorder (!%p894_p7), %v647_v1, 0 }
 0x132   : > { %v561_v5 = vmax.f32 %v542_v63, %v544_v2  ;;  %v564_v6 = vmax.f32 %v548_v3, %v550_v4 }
 0x134   : > { %562 = vmax.xlane.f32.xlu0 %v561_v5 }
 0x138   : > { %565 = vmax.xlane.f32.xlu0 %v564_v6 }
 0x14e   : > { %619 = vperm.xlu0 %1045, %v559_v7  }
 0x1c1   : > { %v563_v9 = vpop.xlane.xlu0 %562 }
 0x1c2   : > { %v569_v10 = vmax.f32 %v567_v8, %v563_v9 }
 0x1c4   : > { %v573_v13 = vsub.f32 %v567_v8, %v569_v10  ;;  %614 = vst.msk [vmem:[#allocation2] sm:$0xff] %vm611_vm3, %v569_v10  ;;  %583 = vperm.xlu1 %1044, %v569_v10  }
 0x1c5   : > { %v566_v14 = vpop.xlane.xlu0 %565 }
 0x1c6   : > { %v570_v15 = vmax.f32 %v568_v12, %v566_v14  ;;  %v575_v49 = vmul.f32 1.442695, %v573_v13 }
 0x1c8   : > { %v574_v18 = vsub.f32 %v568_v12, %v570_v15  ;;  %615 = vst.msk [vmem:[#allocation2 + $0x8] sm:$0xff] %vm611_vm3, %v570_v15  ;;  %588 = vperm.xlu1 %1044, %v570_v15  }
 0x1ca   : > { %v577_v50 = vmul.f32 1.442695, %v574_v18 }
 0x1cb   : > { %v661_v10 = vld [vmem:[#allocation2] sm:$0xff] (!%p894_p7) }
 0x1cc   : > { %622 = vperm.xlu1 %1044, %v560_v19  }
 0x1cd   : > { %v620_v22 = vpop.permute.xlu0 %619 }
 0x1ce   : > { %vm624_vm4 = vcmp.eq.s32.totalorder %v557_v20, %v620_v22  ;;  %vm625_vm5 = vcmp.eq.s32.totalorder %v558_v21, %v620_v22 }
 0x1cf   : > { %v628_v23 = vsel %vm624_vm4, %v542_v63, 0.0  ;;  %v629_v24 = vsel %vm625_vm5, %v544_v2, 0.0  ;;  %v662_v12 = vld [vmem:[#allocation2 + $0x8] sm:$0xff] (!%p894_p7) }
 0x1d0   : > { %v632_v25 = vadd.f32 %v629_v24, %v628_v23 }
 0x1d2   : > { %633 = vadd.xlane.f32.xlu0 %v632_v25 }
 0x243   : > { %v584_v26 = vpop.permute.xlu1 %583 }
 0x244   : > { %v591_v27 = vsub.f32 %v542_v63, %v584_v26  ;;  %v592_v28 = vsub.f32 %v544_v2, %v584_v26 }
 0x246   : > { %v595_v29 = vmul.f32 1.442695, %v591_v27  ;;  %v597_v30 = vmul.f32 1.442695, %v592_v28 }
 0x247   : > { %v589_v31 = vpop.permute.xlu1 %588 }
 0x248   : > { %1046 = vpow2.f32 %v595_v29  ;;  %v593_v32 = vsub.f32 %v548_v3, %v589_v31  ;;  %v594_v33 = vsub.f32 %v550_v4, %v589_v31 }
 0x249   : > { %1048 = vpow2.f32 %v597_v30 }
 0x24a   : > { %v599_v34 = vmul.f32 1.442695, %v593_v32  ;;  %v601_v35 = vmul.f32 1.442695, %v594_v33 }
 0x24b   : > { %v623_v38 = vpop.permute.xlu1 %622 }
 0x24c   : > { %1050 = vpow2.f32 %v599_v34  ;;  %vm626_vm6 = vcmp.eq.s32.totalorder %v557_v20, %v623_v38  ;;  %vm627_vm7 = vcmp.eq.s32.totalorder %v558_v21, %v623_v38 }
 0x24d   : > { %1052 = vpow2.f32 %v601_v35  ;;  %v630_v43 = vsel %vm626_vm6, %v548_v3, 0.0  ;;  %v631_v44 = vsel %vm627_vm7, %v550_v4, 0.0  ;;  %v1119_v4 = vmov (!%p894_p7), 0.0  }
 0x24e   : > { %v635_v45 = vadd.f32 %v631_v44, %v630_v43  ;;  %1054 = vpow2.f32 %v575_v49  ;;  %v897_v5 = vsel (!%p894_p7), %vm655_vm8, 1.0, %v1119_v4  ;;  %v898_v6 = vsel (!%p894_p7), %vm656_vm9, 1.0, %v1119_v4 }
 0x24f   : > { %1056 = vpow2.f32 %v577_v50  ;;  %v713_v7 = vsel (!%p894_p7), %vm611_vm3, %v897_v5, 0.0  ;;  %v714_v8 = vsel (!%p894_p7), %vm611_vm3, %v898_v6, 0.0 }
 0x250   : > { %v715_v9 = vadd.f32 (!%p894_p7), %v714_v8, %v713_v7 }
 0x252   : > { %v1047_v36 = vpop.eup %1046 }
 0x253   : > { %v1049_v37 = vpop.eup %1048 }
 0x254   : > { %v603_v39 = vadd.f32 %v1049_v37, %v1047_v36 }
 0x256   : > { %v1051_v40 = vpop.eup %1050  ;;  %604 = vadd.xlane.f32.xlu1 %v603_v39 }
 0x257   : > { %v1053_v41 = vpop.eup %1052 }
 0x258   : > { %v606_v42 = vadd.f32 %v1053_v41, %v1051_v40  ;;  %v1055_v51 = vpop.eup %1054 }
 0x259   : > { %v579_v53 = vmul.f32 %v1055_v51, %v571_v52  ;;  %v1057_v54 = vpop.eup %1056 }
 0x25a   : > { %607 = vadd.xlane.f32.xlu1 %v606_v42  ;;  %v580_v58 = vmul.f32 %v1057_v54, %v572_v56 }
 0x25e   : > { %636 = vadd.xlane.f32.xlu1 %v635_v45 }
 0x25f   : > { %v634_v47 = vpop.xlane.xlu0 %633 }
 0x260   : > { %v638_v48 = vadd.f32 %v634_v47, %v616_v46 }
 0x262   : > { %640 = vst.msk [vmem:[#allocation4] sm:$0xff] %vm611_vm3, %v638_v48  ;;  %716 = vadd.xlane.f32.xlu1 (!%p894_p7), %v715_v9 }
 0x269   : > { %v671_v13 = vld [vmem:[#allocation4] sm:$0xff] (!%p894_p7) }
 0x26a   : > { %vm675_vm10 = vcmp.ge.f32.partialorder (!%p894_p7), %v671_v13, %v661_v10 }
 0x26b   : > { %v895_v20 = vsel (!%p894_p7), %vm675_vm10, 1.0, %v1119_v4 }
 0x26c   : > { %v695_v25 = vsel (!%p894_p7), %vm655_vm8, %v895_v20, 0.0 }
 0x26d   : > { %v697_v31 = vsel (!%p894_p7), %vm611_vm3, %v695_v25, 0.0 }
 0x2e3   : > { %v605_v55 = vpop.xlane.xlu1 %604 }
 0x2e4   : > { %v609_v57 = vadd.f32 %v605_v55, %v579_v53 }
 0x2e6   : > { %612 = vst.msk [vmem:[#allocation3] sm:$0xff] %vm611_vm3, %v609_v57 }
 0x2e7   : > { %v608_v59 = vpop.xlane.xlu1 %607 }
 0x2e8   : > { %v610_v60 = vadd.f32 %v608_v59, %v580_v58  ;;  %645 = sbr.rel (%p894_p7) target bundleno = 989 (0x3dd), region = 48 }
 0x2ea   : > { %613 = vst.msk [vmem:[#allocation3 + $0x8] sm:$0xff] %vm611_vm3, %v610_v60 }
 0x2eb   : > { %v637_v62 = vpop.xlane.xlu1 %636 }
 0x2ec   : > { %v639_v63 = vadd.f32 %v637_v62, %v617_v61 }
 0x2ed   : > { %v663_v2 = vld [vmem:[#allocation3] sm:$0xff] (!%p894_p7) }
 0x2ee   : > { %641 = vst.msk [vmem:[#allocation4 + $0x8] sm:$0xff] %vm611_vm3, %v639_v63  ;;  %1058 = vlog2.f32 (!%p894_p7), %v663_v2 }
 0x2ef   : > { %v717_v35 = vpop.xlane.xlu1 %716 }
 0x2f0   : > { %v718_v36 = vrot.slane %v717_v35, 4 }
 0x2f1   : > { %v664_v3 = vld [vmem:[#allocation3 + $0x8] sm:$0xff] }
 0x2f2   : > { %1060 = vlog2.f32 %v664_v3  ;;  %v719_v37 = vadd.f32 %v718_v36, %v717_v35 }
 0x2f4   : > { %v720_v41 = vrot.slane %v719_v37, 2 }
 0x2f5   : > { %v672_v14 = vld [vmem:[#allocation4 + $0x8] sm:$0xff] }
 0x2f6   : > { %vm676_vm11 = vcmp.ge.f32.partialorder %v672_v14, %v662_v12  ;;  %v721_v47 = vadd.f32 %v720_v41, %v719_v37 }
 0x2f7   : > { %v896_v21 = vsel %vm676_vm11, 1.0, %v1119_v4 }
 0x2f8   : > { %v1059_v15 = vpop.eup %1058  ;;  %v696_v26 = vsel %vm656_vm9, %v896_v21, 0.0  ;;  %v722_v52 = vrot.slane %v721_v47, 1 }
 0x2f9   : > { %v666_v17 = vmul.f32 0.6931472, %v1059_v15  ;;  %v698_v32 = vsel %vm611_vm3, %v696_v26, 0.0 }
 0x2fa   : > { %v699_v34 = vadd.f32 %v698_v32, %v697_v31  ;;  %v723_v55 = vadd.f32 %v722_v52, %v721_v47 }
 0x2fb   : > { %v669_v19 = vadd.f32 %v666_v17, %v661_v10 }
 0x2fc   : > { %v1061_v16 = vpop.eup %1060 }
 0x2fd   : > { %v668_v18 = vmul.f32 0.6931472, %v1061_v16  ;;  %v673_v23 = vsub.f32 %v669_v19, %v671_v13 }
 0x2ff   : > { %v670_v22 = vadd.f32 %v668_v18, %v662_v12  ;;  %v681_v27 = vsel %vm655_vm8, %v673_v23, 0.0 }
 0x300   : > { %v683_v29 = vsel %vm611_vm3, %v681_v27, 0.0 }
 0x301   : > { %v674_v24 = vsub.f32 %v670_v22, %v672_v14 }
 0x303   : > { %v682_v28 = vsel %vm656_vm9, %v674_v24, 0.0 }
 0x304   : > { %v684_v30 = vsel %vm611_vm3, %v682_v28, 0.0 }
 0x305   : > { %v685_v33 = vadd.f32 %v684_v30, %v683_v29 }
 0x307   : > { %686 = vadd.xlane.f32.xlu0 %v685_v33 }
 0x30b   : > { %700 = vadd.xlane.f32.xlu0 %v699_v34 }
 0x394   : > { %v687_v38 = vpop.xlane.xlu0 %686 }
 0x395   : > { %v688_v39 = vrot.slane %v687_v38, 4 }
 0x397   : > { %v689_v40 = vadd.f32 %v688_v39, %v687_v38 }
 0x398   : > { %v701_v42 = vpop.xlane.xlu0 %700 }
 0x399   : > { %v690_v43 = vrot.slane %v689_v40, 2  ;;  %v702_v44 = vrot.slane %v701_v42, 4 }
 0x39b   : > { %v703_v45 = vadd.f32 %v702_v44, %v701_v42  ;;  %v691_v46 = vadd.f32 %v690_v43, %v689_v40 }
 0x39d   : > { %v704_v48 = vrot.slane %v703_v45, 2  ;;  %v692_v49 = vrot.slane %v691_v46, 1 }
 0x39f   : > { %v705_v50 = vadd.f32 %v704_v48, %v703_v45  ;;  %v693_v51 = vadd.f32 %v692_v49, %v691_v46 }
 0x3a1   : > { %1003 = vpush %v693_v51  ;;  %v706_v53 = vrot.slane %v705_v50, 1 }
 0x3a3   : > { %v707_v54 = vadd.f32 %v706_v53, %v705_v50 }
 0x3a5   : > { %1005 = vpush %v707_v54 }
 0x3a6   : > { %1007 = vpush %v723_v55 }
 0x3d2   : > { %s1004_s18 = spop %1003 }
 0x3d3   : > { %v732_v59 = vstv %s1004_s18 }
 0x3d6   : > { %s1006_s27 = spop %1005 }
 0x3d7   : > { %v730_v56 = vstv %s1006_s27  ;;  %s1008_s28 = spop %1007 }
 0x3d8   : > { %v728_v57 = vstv %s1008_s28 }
 0x3d9   : > { %v729_v58 = vsel %vm727_vm12, %v728_v57, 0.0 }
 0x3da   : > { %v731_v60 = vsel %vm726_vm13, %v730_v56, %v729_v58 }
 0x3db   : > { %v733_v61 = vsel %vm725_vm14, %v732_v59, %v731_v60 }
 0x3dc   : > { %734 = vst [vmem:[#allocation5] sm:$0x1] %v733_v61 }
 0x3dd PF: > { %p1352_p8 = scmp.eq.s32.totalorder %s848_s21, 1  ;;  %s1120_s30 = smov [#allocation5]  }
 0x3de   : > { %s744_s6 = sshll.u32 %s1120_s30, 4  ;;  %s745_s6 = int_to_ptr.vmem [resolvable:$true] %s744_s6 }
 0x3df   : > { %s1062_s7 = scalar_lea.vmem %s745_s6, 16  ;;  %s1068_s8 = scalar_lea.vmem %s745_s6, 32 }
 0x3e0   : > { %p1063_p9 = scmp.ne.s32.totalorder %s745_s6, %s1062_s7  ;;  %p1069_p12 = scmp.lt.s32.totalorder %s745_s6, %s745_s6 }
 0x3e1   : > { %p1070_p13 = scmp.lt.s32.totalorder %s1068_s8, %s1062_s7 }
 0x3e2   : > { %p1064_p10 = pnand %p1063_p9, %p1352_p8 }
 0x3e3   : > { %p1071_p0 = por %p1070_p13, %p1069_p12 }
 0x3e4   : > { %p1065_p11 = pneg %p1064_p10 }
 0x3e6   : > { %p1072_p1 = pnand %p1071_p0, %p1065_p11 }
 0x3e8   : > { %1075 = shalt.err (!%p1072_p1)
}
 0x3e9   : > { %s1076_s10 = scalar_lea.hbm %s1392_s5, 16 }
 0x3ea   : > { %p1077_p2 = scmp.ne.s32.totalorder %s1392_s5, %s1076_s10  ;;  %p1082_p5 = scmp.lt.u32.totalorder %s1076_s10, %s1392_s5 }
 0x3ec   : > { %p1078_p3 = pnand %p1077_p2, %p1352_p8 }
 0x3ee   : > { %p1079_p4 = pneg %p1078_p3 }
 0x3f0   : > { %p1084_p6 = pnand %p1082_p5, %p1079_p4 }
 0x3f2   : > { %1087 = shalt.err (!%p1084_p6)
}
 0x3f3   : > { %1010 = dma.vmem_to_hbm [thread:$0]  (%p1352_p8), %s745_s6, 16, %s1392_s5, [#allocation6]  }
 0x3f4   : > { %1101 = dma.done.wait (%p1352_p8), [#allocation6], 16  }
 0x3f5   : > { %1103 = vsyncadd (%p1352_p8), [#allocation6], 4294967280 }
 0x3f6 PF: > { %s16_s20 = sadd.s32 1, %s1114_s20   ;;  %s1396_s18 = smov %s1110_s19 }
 0x3f7   : > { %p13_p7 = scmp.ge.s32.totalorder %s16_s20, 4   ;;  %s1397_s19 = smov %s1399_s22 }
 0x3f9   :  { %15 = sbr.rel (!%p13_p7) target bundleno = 2 (0x2), region = 88 }
 0x400   :  { %757 = vsyncpa [#allocation6], 1 }
 0x401   :  { %759 = vsyncpa [#allocation6 + $0x1], 1 }

</bundles_post_ra>
